<compile_context>
chip_gen: v5e
topology: v5e:2x2
jax: 0.10.0
libtpu: 0.0.40
codegen_flags: <defaults>
</compile_context>

<pallas_src>
import functools

import jax
import jax.numpy as jnp
import numpy as np
from jax.experimental import pallas as pl
from jax.experimental.pallas import tpu as pltpu


def _stacker_kernel(x_ref, o_ref, *, n, d, tt):
    """x_ref: (tt*n, D) input slab; o_ref: (tt, n*D) output slab.

    Output row t, feature slice [k*D, (k+1)*D) == input frame t*n + k.
    Implemented as n bulk sublane-strided copies (n is a small static constant,
    loop fully unrolled).
    """
    for k in range(n):
        o_ref[:, k * d:(k + 1) * d] = x_ref[pl.ds(k, tt, stride=n), :]


def stacker(x: jax.Array, n: int, *, block_rows: int | None = None) -> jax.Array:
    """Pallas equivalent of Stacker(n).forward(x) for x of shape (B, T, D)."""
    b, t, d = x.shape
    t_out = t // n  # time_clamp // n
    if t_out == 0:
        # T < n: empty output, nothing for the kernel to do.
        return jnp.zeros((b, 0, n * d), dtype=x.dtype)

    itemsize = jnp.dtype(x.dtype).itemsize
    # Sublane packing multiple: 8 for f32, 16 for bf16, 32 for int8.
    sub = max(8, 32 // itemsize)

    if block_rows is None:
        # Size the input block around ~2 MiB so double-buffered in+out blocks
        # (~4x block bytes total) stay far below the 32 MiB scoped-VMEM default
        # on every generation (incl. v7x's smaller 64 MiB physical VMEM).
        target_in_block_bytes = 2 * 1024 * 1024
        tt = (target_in_block_bytes // (n * d * itemsize)) // sub * sub
        tt = max(sub, tt)
    else:
        tt = max(sub, (block_rows + sub - 1) // sub * sub)

    # Don't make the block larger than the (sublane-rounded) output time dim.
    tt = min(tt, pl.cdiv(t_out, sub) * sub)

    # v7x megacore: keep >= 2 parallel grid blocks when possible so both
    # TensorCores get work (no-op on v5e/v6e which have a single TC).
    if b * pl.cdiv(t_out, tt) < 2 and t_out > sub:
        tt = max(sub, pl.cdiv(pl.cdiv(t_out, 2), sub) * sub)

    grid = (b, pl.cdiv(t_out, tt))
    kernel = functools.partial(_stacker_kernel, n=n, d=d, tt=tt)

    return pl.pallas_call(
        kernel,
        out_shape=jax.ShapeDtypeStruct((b, t_out, n * d), x.dtype),
        grid=grid,
        # Input block: the tt*n consecutive input frames feeding tt output rows.
        # Block index ti along time (block size tt*n) => element offset ti*tt*n,
        # so frames beyond time_clamp only appear as dropped out-of-bounds rows.
        in_specs=[pl.BlockSpec((None, tt * n, d), lambda bi, ti: (bi, ti, 0))],
        # Output block: tt lane-dense rows of length n*D.
        out_specs=pl.BlockSpec((None, tt, n * d), lambda bi, ti: (bi, ti, 0)),
        compiler_params=pltpu.CompilerParams(
            dimension_semantics=("parallel", "parallel")),
        # Pure data movement: one full read + one full write of the clamped tensor.
        cost_estimate=pl.CostEstimate(
            flops=0,
            transcendentals=0,
            bytes_accessed=2 * b * t_out * n * d * itemsize),
    )(x)


def stacker_ref(x: jax.Array, n: int) -> jax.Array:
    """Pure-JAX reference mirroring the PyTorch forward exactly."""
    b, t, d = x.shape
    time_clamp = t - t % n
    return x[:, :time_clamp, :].reshape(b, t // n, d * n)


if __name__ == "__main__":
    key = jax.random.PRNGKey(0)

    # Case 1: B=2, T=67 (not a multiple of n -> exercises the clamp and a
    # partial trailing time block), D=128 (lane-aligned), n=2, f32.
    B, T, D, N = 2, 67, 128, 2
    x = jax.random.normal(key, (B, T, D), dtype=jnp.float32)
    out = jax.block_until_ready(stacker(x, N))
    ref = stacker_ref(x, N)
    assert out.shape == ref.shape == (B, T // N, D * N), (out.shape, ref.shape)
    np.testing.assert_array_equal(np.asarray(out), np.asarray(ref))

    # Case 2: same input, but force small time tiles to exercise a multi-block
    # time grid with a ragged last block.
    out_small = jax.block_until_ready(stacker(x, N, block_rows=8))
    np.testing.assert_array_equal(np.asarray(out_small), np.asarray(ref))

    # Case 3: bf16, n=3, T not a multiple of n (checks packed-sublane tiling).
    key2 = jax.random.PRNGKey(1)
    x3 = jax.random.normal(key2, (2, 50, 128), dtype=jnp.bfloat16)
    out3 = jax.block_until_ready(stacker(x3, 3))
    ref3 = stacker_ref(x3, 3)
    assert out3.shape == ref3.shape == (2, 16, 384), (out3.shape, ref3.shape)
    np.testing.assert_array_equal(np.asarray(out3), np.asarray(ref3))

    # Case 4: T < n -> empty output (handled in the wrapper, no kernel launch).
    x4 = jax.random.normal(key, (1, 2, 128), dtype=jnp.float32)
    out4 = jax.block_until_ready(stacker(x4, 4))
    assert out4.shape == (1, 0, 512), out4.shape

    print("KERNEL_OK")
</pallas_src>

<mosaic_0001>
module attributes {stable_mosaic.version = 11 : i64} {
  func.func @_stacker_kernel(%arg0: i32, %arg1: i32, %arg2: memref<1x80x128xf32, #tpu.memory_space<vmem>>, %arg3: memref<1x40x256xf32, #tpu.memory_space<vmem>>) attributes {dimension_semantics = [#tpu.dimension_semantics<parallel>, #tpu.dimension_semantics<parallel>], iteration_bounds = array<i64: 2, 1>, scalar_prefetch = 0 : i64, scratch_operands = 0 : i64, tpu.core_type = #tpu.core_type<tc>, window_params = [{transform_indices = @transform_0, window_bounds = array<i64: 1, 80, 128>}, {transform_indices = @transform_1, window_bounds = array<i64: 1, 40, 256>}]} {
    %c0 = arith.constant 0 : index
    %c0_0 = arith.constant 0 : index
    %c0_1 = arith.constant 0 : index
    %0 = tpu.strided_load %arg2[%c0, %c0_0, %c0_1] {strides = array<i32: 1, 2, 1>} : memref<1x80x128xf32, #tpu.memory_space<vmem>>, vector<1x40x128xf32>
    %1 = vector.shape_cast %0 : vector<1x40x128xf32> to vector<40x128xf32>
    %c0_2 = arith.constant 0 : index
    %c0_3 = arith.constant 0 : index
    %c0_4 = arith.constant 0 : index
    %2 = vector.load %arg3[%c0_2, %c0_3, %c0_4] : memref<1x40x256xf32, #tpu.memory_space<vmem>>, vector<1x40x128xf32>
    %3 = vector.shape_cast %2 : vector<1x40x128xf32> to vector<40x128xf32>
    %4 = vector.shape_cast %1 : vector<40x128xf32> to vector<1x40x128xf32>
    tpu.vector_store %arg3[%c0_2, %c0_3, %c0_4], %4 {strides = array<i32>} : memref<1x40x256xf32, #tpu.memory_space<vmem>>, vector<1x40x128xf32>,
    %c0_5 = arith.constant 0 : index
    %c1 = arith.constant 1 : index
    %c0_6 = arith.constant 0 : index
    %5 = tpu.strided_load %arg2[%c0_5, %c1, %c0_6] {strides = array<i32: 1, 2, 1>} : memref<1x80x128xf32, #tpu.memory_space<vmem>>, vector<1x40x128xf32>
    %6 = vector.shape_cast %5 : vector<1x40x128xf32> to vector<40x128xf32>
    %c0_7 = arith.constant 0 : index
    %c0_8 = arith.constant 0 : index
    %c128 = arith.constant 128 : index
    %7 = vector.load %arg3[%c0_7, %c0_8, %c128] : memref<1x40x256xf32, #tpu.memory_space<vmem>>, vector<1x40x128xf32>
    %8 = vector.shape_cast %7 : vector<1x40x128xf32> to vector<40x128xf32>
    %9 = vector.shape_cast %6 : vector<40x128xf32> to vector<1x40x128xf32>
    tpu.vector_store %arg3[%c0_7, %c0_8, %c128], %9 {strides = array<i32>} : memref<1x40x256xf32, #tpu.memory_space<vmem>>, vector<1x40x128xf32>,
    return
  }
  func.func @transform_0(%arg0: i32, %arg1: i32) -> (i32, i32, i32) {
    %c0_i32 = arith.constant 0 : i32
    %c0_i32_0 = arith.constant 0 : i32
    return %arg0, %arg1, %c0_i32 : i32, i32, i32
  }
  func.func @transform_1(%arg0: i32, %arg1: i32) -> (i32, i32, i32) {
    %c0_i32 = arith.constant 0 : i32
    %c0_i32_0 = arith.constant 0 : i32
    return %arg0, %arg1, %c0_i32 : i32, i32, i32
  }
}

</mosaic_0001>

<bundles_post_ra>
// kernel: tpu_custom_call.1
= control target key start
LH: loop header
LB: loop body
LE: loop exit
PB: predicated region body
PF: predicated region fallthrough
CT: control target
= control target key end

     0   :  { %s368_s6 = smov 0   ;;  %s370_s7 = smov 0   ;;  %s401_s0 = inlined_call_operand.vmem [shape: f32[2,67,128], index: 0, kind: input, shape index: {}]   ;;  %s402_s1 = inlined_call_operand.vmem [shape: f32[2,33,256], index: 1, kind: output, shape index: {}]  }
   0x1   :  { %s372_s8 = smov 0  }
   0x2 LB: > { %s23_s9 = sadd.s32 1, %s352_s7  ;;  %p294_p0 = scmp.ge.s32.totalorder %s356_s8, 1  ;;  %s356_s8 = sphi %s372_s8, %s11_s8   ;;  %s352_s7 = sphi %s370_s7, %s404_s7   ;;  %s348_s6 = sphi %s368_s6, %s403_s6  }
   0x3   : > { %p25_p1 = scmp.ge.s32.totalorder %s23_s9, 2  ;;  %p112_p2 = scmp.lt.s32.totalorder %s356_s8, 3 }
   0x5   : > { %s406_s9 = smov (%p25_p1, %s23_s9), 0  ;;  %p113_p3 = pnand %p294_p0, %p112_p2 }
   0x6   : > { %p146_p4 = scmp.lt.s32.totalorder (!%p113_p3), %s348_s6, 1 }
   0x7   : > { %116 = sbr.rel (%p113_p3) target bundleno = 27 (0x1b), region = 24 }
   0xc   : > { %s408_s6 = smov (!%p146_p4, %s348_s6), 1 }
   0xd   : > { %s308_s10 = smul.u32 72, %s408_s6 }
   0xe   : > { %s309_s11 = smul.u32 80, %s408_s6 }
   0xf   : > { %s153_s14 = scalar_lea.vmem %s401_s0, %s308_s10 }
  0x10   : > { %s166_s17 = scalar_lea.vmem %s402_s1, %s309_s11  ;;  %v168_v0 = vld [vmem:[%s153_s14] ss:$2 sm:$0xff]  ;;  %v297_v1 = vld [vmem:[%s153_s14 + $0x10] ss:$2 sm:$0xff]  ;;  %v301_v5 = vld [vmem:[%s153_s14 + $0x1] ss:$2 sm:$0xff] }
  0x11   : > { %v298_v2 = vld [vmem:[%s153_s14 + $0x20] ss:$2 sm:$0xff]  ;;  %177 = vst [vmem:[%s166_s17] sm:$0xff] %v168_v0  ;;  %v299_v3 = vld [vmem:[%s153_s14 + $0x30] ss:$2 sm:$0xff]  ;;  %v302_v6 = vld [vmem:[%s153_s14 + $0x11] ss:$2 sm:$0xff] }
  0x12   : > { %178 = vst [vmem:[%s166_s17 + $0x10] sm:$0xff] %v297_v1  ;;  %v300_v4 = vld [vmem:[%s153_s14 + $0x40] ss:$2 sm:$0xff]  ;;  %v303_v7 = vld [vmem:[%s153_s14 + $0x21] ss:$2 sm:$0xff] }
  0x13   : > { %179 = vst [vmem:[%s166_s17 + $0x20] sm:$0xff] %v298_v2  ;;  %v304_v8 = vld [vmem:[%s153_s14 + $0x31] ss:$2 sm:$0xff]  ;;  %v305_v9 = vld [vmem:[%s153_s14 + $0x41] ss:$2 sm:$0xff] }
  0x14   : > { %180 = vst [vmem:[%s166_s17 + $0x30] sm:$0xff] %v299_v3 }
  0x15   : > { %181 = vst [vmem:[%s166_s17 + $0x40] sm:$0xff] %v300_v4 }
  0x16   : > { %192 = vst [vmem:[%s166_s17 + $0x8] sm:$0xff] %v301_v5 }
  0x17   : > { %193 = vst [vmem:[%s166_s17 + $0x18] sm:$0xff] %v302_v6 }
  0x18   : > { %194 = vst [vmem:[%s166_s17 + $0x28] sm:$0xff] %v303_v7 }
  0x19   : > { %195 = vst [vmem:[%s166_s17 + $0x38] sm:$0xff] %v304_v8 }
  0x1a   : > { %196 = vst [vmem:[%s166_s17 + $0x48] sm:$0xff] %v305_v9 }
  0x1b PF: > { %s11_s8 = sadd.s32 1, %s356_s8   ;;  %s403_s6 = smov %s352_s7 }
  0x1c   : > { %p8_p5 = scmp.ge.s32.totalorder %s11_s8, 4   ;;  %s404_s7 = smov %s406_s9 }
  0x1e   :  { %10 = sbr.rel (!%p8_p5) target bundleno = 2 (0x2), region = 63 }

</bundles_post_ra>
